<compile_context>
chip_gen: v7x
topology: tpu7x:2x2x1
jax: 0.10.0
libtpu: 0.0.40
codegen_flags: <defaults>
</compile_context>

<pallas_src>
import jax
import jax.numpy as jnp
from jax import lax
from jax.experimental import pallas as pl
from jax.experimental.pallas import tpu as pltpu


def _make_kernel(valid_rows: int, tile_b: int, steps: int, needs_mask: bool):
    def kernel(pred_ref, targ_ref, out_ref, acc_ref):
        s = pl.program_id(0)
        i = pl.program_id(1)

        @pl.when(i == 0)
        def _():
            acc_ref[...] = jnp.zeros_like(acc_ref)

        p = pred_ref[...]
        t = targ_ref[...]
        dot = jnp.sum(p * t, axis=-1, keepdims=True)      # (tile_b, 1)
        pn2 = jnp.sum(p * p, axis=-1, keepdims=True)      # (tile_b, 1)
        tn2 = jnp.sum(t * t, axis=-1, keepdims=True)      # (tile_b, 1)
        # rsqrt(pn2) * rsqrt(tn2) matches the reference dot / (||p||*||t||)
        # without overflowing the f32 product pn2*tn2 for huge rows.
        # No eps clamp, exactly as the reference CUDA kernel.
        cos = dot * lax.rsqrt(pn2) * lax.rsqrt(tn2)        # (tile_b, 1)
        contrib = 1.0 - cos
        if needs_mask:
            # Zero out rows that only exist because of batch padding
            # (padded zero rows would otherwise produce 0 * inf = NaN).
            row0 = (s * steps + i) * tile_b
            rows = row0 + lax.broadcasted_iota(jnp.int32, (tile_b, 1), 0)
            contrib = jnp.where(rows < valid_rows, contrib, 0.0)
        acc_ref[...] += contrib

        @pl.when(i == pl.num_programs(1) - 1)
        def _():
            # single cross-sublane reduce per shard, only on the last step
            out_ref[...] = jnp.sum(acc_ref[...], keepdims=True)   # (1, 1)

    return kernel


def _target_block_bytes() -> int:
    """Generation-aware per-input block size (bytes)."""
    try:
        kind = jax.devices()[0].device_kind.lower()
    except Exception:
        return 4 << 20
    if "v7" in kind:
        # v7x: 3.2 TB/s HBM -> fixed step overhead is the main loss; 64 MiB VMEM.
        return 6 << 20
    if "v5 lite" in kind or "v5e" in kind:
        # v5e: stay friendly to the 16 MiB scoped-VMEM sweet spot.
        return 2 << 20
    return 4 << 20


def _pick_tiling(b_pad: int, D: int, target_block_bytes: int):
    """Choose (num_shards, tile_b) with b_pad a multiple of 8."""
    row_bytes = 4 * D
    units_total = b_pad // 8
    cap_units = max(1, target_block_bytes // (8 * row_bytes))
    # Split across two shards only when it does NOT shrink the per-step block
    # below its cap (so 1-TC chips lose nothing and v7x can use both TCs).
    if b_pad % 16 == 0 and (b_pad // 16) >= cap_units:
        num_shards = 2
    else:
        num_shards = 1
    units_shard = units_total // num_shards
    d = min(units_shard, cap_units)
    while units_shard % d != 0:
        d -= 1
    return num_shards, 8 * d


def cosine_similarity_loss(predictions, targets):
    """predictions, targets: [B, D] float32 -> scalar float32 loss."""
    B, D = predictions.shape
    assert targets.shape == (B, D)
    predictions = predictions.astype(jnp.float32)
    targets = targets.astype(jnp.float32)

    # Pad the batch to a multiple of 8 so every shape takes the tiled,
    # double-buffered path; padded rows are masked inside the kernel.
    b_pad = ((B + 7) // 8) * 8
    needs_mask = b_pad != B
    if needs_mask:
        pad = b_pad - B
        predictions = jnp.pad(predictions, ((0, pad), (0, 0)))
        targets = jnp.pad(targets, ((0, pad), (0, 0)))

    num_shards, tile_b = _pick_tiling(b_pad, D, _target_block_bytes())
    b_shard = b_pad // num_shards
    steps = b_shard // tile_b

    block_bytes = tile_b * D * 4
    # 2 inputs x 2 pipeline buffers x block + scratch/output headroom,
    # capped under v7x's 64 MiB physical VMEM.
    vmem_limit = int(min(max(4 * block_bytes + (8 << 20), 16 << 20), 48 << 20))

    kernel = _make_kernel(B, tile_b, steps, needs_mask)

    cost = pl.CostEstimate(
        flops=8 * B * D,
        transcendentals=2 * B,
        bytes_accessed=8 * B * D,
    )

    partials = pl.pallas_call(
        kernel,
        out_shape=jax.ShapeDtypeStruct((num_shards, 1), jnp.float32),
        grid_spec=pltpu.PrefetchScalarGridSpec(
            num_scalar_prefetch=0,
            grid=(num_shards, steps),
            in_specs=[
                pl.BlockSpec((tile_b, D), lambda s, i: (s * steps + i, 0)),
                pl.BlockSpec((tile_b, D), lambda s, i: (s * steps + i, 0)),
            ],
            out_specs=pl.BlockSpec((1, 1), lambda s, i: (s, 0)),
            scratch_shapes=[pltpu.VMEM((tile_b, 1), jnp.float32)],
        ),
        compiler_params=pltpu.CompilerParams(
            # outer axis: independent per-shard partial sums (2-TC split on v7x)
            # inner axis: sequential reduction into the resident output block
            # TODO(synk): switch the outer axis to pltpu.CORE_PARALLEL if a v7x
            # profile shows one TensorCore idle with plain "parallel".
            dimension_semantics=("parallel", "arbitrary"),
            vmem_limit_bytes=vmem_limit,
        ),
        cost_estimate=cost,
    )(predictions, targets)

    return jnp.sum(partials) / jnp.float32(B)


def _ref_loss(p, t):
    dot = jnp.sum(p * t, axis=-1)
    return jnp.mean(
        1.0 - dot / (jnp.linalg.norm(p, axis=-1) * jnp.linalg.norm(t, axis=-1))
    )


if __name__ == "__main__":
    key = jax.random.PRNGKey(0)
    k1, k2, k3, k4 = jax.random.split(key, 4)

    # Small shape consistent with the module's [batch, dim] inputs.
    B, D = 16, 256
    predictions = jax.random.normal(k1, (B, D), dtype=jnp.float32)
    targets = jax.random.normal(k2, (B, D), dtype=jnp.float32)
    loss = jax.block_until_ready(cosine_similarity_loss(predictions, targets))
    ref = _ref_loss(predictions, targets)
    assert jnp.allclose(loss, ref, rtol=1e-5, atol=1e-5), (loss, ref)

    # Exercise the padded / masked path (B not a multiple of 8).
    B2, D2 = 13, 256
    p2 = jax.random.normal(k3, (B2, D2), dtype=jnp.float32)
    t2 = jax.random.normal(k4, (B2, D2), dtype=jnp.float32)
    loss2 = jax.block_until_ready(cosine_similarity_loss(p2, t2))
    ref2 = _ref_loss(p2, t2)
    assert jnp.allclose(loss2, ref2, rtol=1e-5, atol=1e-5), (loss2, ref2)

    print("KERNEL_OK")
</pallas_src>

<mosaic_0001>
module attributes {stable_mosaic.version = 11 : i64} {
  func.func @kernel(%arg0: i32, %arg1: i32, %arg2: memref<16x256xf32, #tpu.memory_space<vmem>>, %arg3: memref<16x256xf32, #tpu.memory_space<vmem>>, %arg4: memref<1x1xf32, #tpu.memory_space<vmem>>, %arg5: memref<16x1xf32, #tpu.memory_space<vmem>>) attributes {dimension_semantics = [#tpu.dimension_semantics<parallel>, #tpu.dimension_semantics<arbitrary>], iteration_bounds = array<i64: 1, 1>, scalar_prefetch = 0 : i64, scratch_operands = 1 : i64, tpu.core_type = #tpu.core_type<tc>, window_params = [{transform_indices = @transform_0, window_bounds = array<i64: 16, 256>}, {transform_indices = @transform_1, window_bounds = array<i64: 16, 256>}, {transform_indices = @transform_2, window_bounds = array<i64: 1, 1>}]} {
    %c0_i32 = arith.constant 0 : i32
    %0 = arith.cmpi eq, %arg1, %c0_i32 : i32
    %1 = arith.extui %0 : i1 to i32
    %c0_i32_0 = arith.constant 0 : i32
    %2 = arith.cmpi ne, %1, %c0_i32_0 : i32
    scf.if %2 {
      %cst_13 = arith.constant 0.000000e+00 : f32
      %26 = vector.broadcast %cst_13 : f32 to vector<16x1xf32>
      %c0_14 = arith.constant 0 : index
      %c0_15 = arith.constant 0 : index
      %27 = vector.load %arg5[%c0_14, %c0_15] : memref<16x1xf32, #tpu.memory_space<vmem>>, vector<16x1xf32>
      tpu.vector_store %arg5[%c0_14, %c0_15], %26 {strides = array<i32>} : memref<16x1xf32, #tpu.memory_space<vmem>>, vector<16x1xf32>,
    } else {
    }
    %c0 = arith.constant 0 : index
    %c0_1 = arith.constant 0 : index
    %3 = vector.load %arg2[%c0, %c0_1] : memref<16x256xf32, #tpu.memory_space<vmem>>, vector<16x256xf32>
    %c0_2 = arith.constant 0 : index
    %c0_3 = arith.constant 0 : index
    %4 = vector.load %arg3[%c0_2, %c0_3] : memref<16x256xf32, #tpu.memory_space<vmem>>, vector<16x256xf32>
    %5 = arith.mulf %3, %4 : vector<16x256xf32>
    %cst = arith.constant dense<0.000000e+00> : vector<16xf32>
    %6 = vector.multi_reduction <add>, %5, %cst [1] : vector<16x256xf32> to vector<16xf32>
    %7 = vector.shape_cast %6 : vector<16xf32> to vector<16x1xf32>
    %8 = arith.mulf %3, %3 : vector<16x256xf32>
    %cst_4 = arith.constant dense<0.000000e+00> : vector<16xf32>
    %9 = vector.multi_reduction <add>, %8, %cst_4 [1] : vector<16x256xf32> to vector<16xf32>
    %10 = vector.shape_cast %9 : vector<16xf32> to vector<16x1xf32>
    %11 = arith.mulf %4, %4 : vector<16x256xf32>
    %cst_5 = arith.constant dense<0.000000e+00> : vector<16xf32>
    %12 = vector.multi_reduction <add>, %11, %cst_5 [1] : vector<16x256xf32> to vector<16xf32>
    %13 = vector.shape_cast %12 : vector<16xf32> to vector<16x1xf32>
    %14 = math.rsqrt %10 : vector<16x1xf32>
    %15 = arith.mulf %7, %14 : vector<16x1xf32>
    %16 = math.rsqrt %13 : vector<16x1xf32>
    %17 = arith.mulf %15, %16 : vector<16x1xf32>
    %cst_6 = arith.constant 1.000000e+00 : f32
    %18 = vector.broadcast %cst_6 : f32 to vector<16x1xf32>
    %19 = arith.subf %18, %17 : vector<16x1xf32>
    %c0_7 = arith.constant 0 : index
    %c0_8 = arith.constant 0 : index
    %20 = vector.load %arg5[%c0_7, %c0_8] : memref<16x1xf32, #tpu.memory_space<vmem>>, vector<16x1xf32>
    %21 = arith.addf %20, %19 : vector<16x1xf32>
    %c0_9 = arith.constant 0 : index
    %c0_10 = arith.constant 0 : index
    %22 = vector.load %arg5[%c0_9, %c0_10] : memref<16x1xf32, #tpu.memory_space<vmem>>, vector<16x1xf32>
    tpu.vector_store %arg5[%c0_9, %c0_10], %21 {strides = array<i32>} : memref<16x1xf32, #tpu.memory_space<vmem>>, vector<16x1xf32>,
    %c0_i32_11 = arith.constant 0 : i32
    %23 = arith.cmpi eq, %arg1, %c0_i32_11 : i32
    %24 = arith.extui %23 : i1 to i32
    %c0_i32_12 = arith.constant 0 : i32
    %25 = arith.cmpi ne, %24, %c0_i32_12 : i32
    scf.if %25 {
      %c0_13 = arith.constant 0 : index
      %c0_14 = arith.constant 0 : index
      %26 = vector.load %arg5[%c0_13, %c0_14] : memref<16x1xf32, #tpu.memory_space<vmem>>, vector<16x1xf32>
      %27 = vector.shape_cast %26 : vector<16x1xf32> to vector<1x16x1xf32>
      %cst_15 = arith.constant dense<0.000000e+00> : vector<1xf32>
      %28 = vector.multi_reduction <add>, %27, %cst_15 [1, 2] : vector<1x16x1xf32> to vector<1xf32>
      %29 = vector.shape_cast %28 : vector<1xf32> to vector<1x1x1xf32>
      %30 = vector.extract %29[0, 0, 0] : f32 from vector<1x1x1xf32>
      %31 = vector.broadcast %30 : f32 to vector<1x1xf32>
      %c0_16 = arith.constant 0 : index
      %c0_17 = arith.constant 0 : index
      %32 = vector.load %arg4[%c0_16, %c0_17] : memref<1x1xf32, #tpu.memory_space<vmem>>, vector<1x1xf32>
      tpu.vector_store %arg4[%c0_16, %c0_17], %31 {strides = array<i32>} : memref<1x1xf32, #tpu.memory_space<vmem>>, vector<1x1xf32>,
    } else {
    }
    return
  }
  func.func @transform_0(%arg0: i32, %arg1: i32) -> (i32, i32) {
    %c1_i32 = arith.constant 1 : i32
    %0 = arith.muli %arg0, %c1_i32 : i32
    %1 = arith.addi %0, %arg1 : i32
    %c0_i32 = arith.constant 0 : i32
    %c0_i32_0 = arith.constant 0 : i32
    return %1, %c0_i32 : i32, i32
  }
  func.func @transform_1(%arg0: i32, %arg1: i32) -> (i32, i32) {
    %c1_i32 = arith.constant 1 : i32
    %0 = arith.muli %arg0, %c1_i32 : i32
    %1 = arith.addi %0, %arg1 : i32
    %c0_i32 = arith.constant 0 : i32
    %c0_i32_0 = arith.constant 0 : i32
    return %1, %c0_i32 : i32, i32
  }
  func.func @transform_2(%arg0: i32, %arg1: i32) -> (i32, i32) {
    %c0_i32 = arith.constant 0 : i32
    %c0_i32_0 = arith.constant 0 : i32
    return %arg0, %c0_i32 : i32, i32
  }
}

</mosaic_0001>

<bundles_post_ra>
// kernel: tpu_custom_call.1
= control target key start
LH: loop header
LB: loop body
LE: loop exit
PB: predicated region body
PF: predicated region fallthrough
CT: control target
= control target key end

     0   :  { %7 = vsyncpa [#allocation4], 0  ;;  %s303_s0 = inlined_call_operand.hbm [shape: f32[16,256], index: 0, kind: input, shape index: {}]   ;;  %s304_s1 = inlined_call_operand.hbm [shape: f32[16,256], index: 1, kind: input, shape index: {}]   ;;  %s305_s2 = inlined_call_operand.hbm [shape: f32[1,1], index: 2, kind: output, shape index: {}]  }
   0x1   :  { %8 = vsyncpa [#allocation7], 0 }
   0x2   :  { %9 = vsyncpa [#allocation5], 0  ;;  %s240_s9 = smov [#allocation3]   ;;  %s168_s13 = scalar_lea.hbm %s303_s0, 512 }
   0x3   :  { %s20_s10 = sshll.u32 %s240_s9, 4  ;;  %p169_p0 = scmp.ne.s32.totalorder %s303_s0, %s168_s13  ;;  %s21_s10 = int_to_ptr.vmem [resolvable:$true] %s20_s10 }
   0x4   :  { %p172_p1 = scmp.lt.u32.totalorder %s168_s13, %s303_s0 }
   0x6   :  { %p174_p2 = pnand %p172_p1, %p169_p0 }
   0x8   :  { %177 = shalt.err (!%p174_p2)
}
   0x9   :  { %s178_s18 = scalar_lea.vmem %s21_s10, 512  ;;  %p183_p4 = scmp.lt.s32.totalorder %s21_s10, %s21_s10 }
   0xa   :  { %p179_p3 = scmp.ne.s32.totalorder %s21_s10, %s178_s18  ;;  %p184_p5 = scmp.lt.s32.totalorder %s178_s18, %s178_s18 }
   0xc   :  { %p185_p6 = por %p184_p5, %p183_p4 }
   0xe   :  { %p186_p7 = pnand %p185_p6, %p179_p3 }
  0x10   :  { %189 = shalt.err (!%p186_p7)
}
  0x11   :  { %s241_s19 = smov 256   ;;  %s242_s20 = smov 16  }
  0x12   :  { %26 = dma.hbm_to_vmem [thread:$0]  %s303_s0, 512, %s21_s10, [#allocation4], %s241_s19, %s241_s19, %s242_s20  }
  0x13   :  { %s243_s23 = smov [#allocation6]   ;;  %s190_s27 = scalar_lea.hbm %s304_s1, 512 }
  0x14   :  { %s37_s24 = sshll.u32 %s243_s23, 4  ;;  %p191_p8 = scmp.ne.s32.totalorder %s304_s1, %s190_s27  ;;  %s38_s24 = int_to_ptr.vmem [resolvable:$true] %s37_s24 }
  0x15   :  { %p194_p9 = scmp.lt.u32.totalorder %s190_s27, %s304_s1 }
  0x17   :  { %p196_p10 = pnand %p194_p9, %p191_p8 }
  0x19   :  { %199 = shalt.err (!%p196_p10)
}
  0x1a   :  { %s200_s4 = scalar_lea.vmem %s38_s24, 512  ;;  %p205_p12 = scmp.lt.s32.totalorder %s38_s24, %s38_s24 }
  0x1b   :  { %p201_p11 = scmp.ne.s32.totalorder %s38_s24, %s200_s4  ;;  %p206_p13 = scmp.lt.s32.totalorder %s200_s4, %s200_s4 }
  0x1d   :  { %p207_p0 = por %p206_p13, %p205_p12 }
  0x1f   :  { %p208_p1 = pnand %p207_p0, %p201_p11 }
  0x21   :  { %211 = shalt.err (!%p208_p1)
}
  0x22   :  { %43 = dma.hbm_to_vmem [thread:$0]  %s304_s1, 512, %s38_s24, [#allocation7], %s241_s19, %s241_s19, %s242_s20  }
  0x23   :  { %234 = dma.done.wait [#allocation4], 512  }
  0x24   :  { %235 = vsyncadd [#allocation4], 4294966784 }
  0x25   :  { %236 = dma.done.wait [#allocation7], 512  }
  0x26   :  { %237 = vsyncadd [#allocation7], 4294966784  ;;  %v61_v0 = vld [vmem:[#allocation3] sm:$0xff]  ;;  %v62_v1 = vld [vmem:[#allocation3 + $0x8] sm:$0xff]  ;;  %vm58_vm0 = vcmask 7168   ;;  %v244_v26 = vmov 0.0  }
  0x27   :  { %v65_v2 = vld [vmem:[#allocation6] sm:$0xff]  ;;  %v79_v3 = vmul.f32 %v61_v0, %v61_v0  ;;  %v80_v4 = vmul.f32 %v62_v1, %v62_v1  ;;  %v66_v5 = vld [vmem:[#allocation6 + $0x8] sm:$0xff]  ;;  %v63_v7 = vld [vmem:[#allocation3 + $0x10] sm:$0xff]  ;;  %59 = vst.msk [vmem:[#allocation2] sm:$0xff] %vm58_vm0, %v244_v26  ;;  %s245_s1 = smov [#allocation8]   ;;  %vm134_vm1 = vcmask 0  }
  0x28   :  { %v89_v6 = vmul.f32 %v65_v2, %v65_v2  ;;  %v64_v8 = vld [vmem:[#allocation3 + $0x18] sm:$0xff]  ;;  %v90_v9 = vmul.f32 %v66_v5, %v66_v5  ;;  %v81_v10 = vmul.f32 %v63_v7, %v63_v7  ;;  %v67_v12 = vld [vmem:[#allocation6 + $0x10] sm:$0xff]  ;;  %v69_v19 = vmul.f32 %v65_v2, %v61_v0  ;;  %60 = vst.msk [vmem:[#allocation2 + $0x8] sm:$0xff] %vm58_vm0, %v244_v26  ;;  %s142_s6 = sshll.u32 %s245_s1, 4  ;;  %s143_s6 = int_to_ptr.vmem [resolvable:$true] %s142_s6 }
  0x29   :  { %v82_v11 = vmul.f32 %v64_v8, %v64_v8  ;;  %v68_v13 = vld [vmem:[#allocation6 + $0x18] sm:$0xff]  ;;  %v83_v14 = vadd.f32 %v80_v4, %v79_v3  ;;  %v91_v15 = vmul.f32 %v67_v12, %v67_v12  ;;  %v70_v20 = vmul.f32 %v66_v5, %v62_v1  ;;  %s212_s8 = scalar_lea.vmem %s143_s6, 16  ;;  %s216_s9 = scalar_lea.vmem %s143_s6, 32 }
  0x2a   :  { %v92_v16 = vmul.f32 %v68_v13, %v68_v13  ;;  %v93_v17 = vadd.f32 %v90_v9, %v89_v6  ;;  %v71_v22 = vmul.f32 %v67_v12, %v63_v7  ;;  %v72_v23 = vmul.f32 %v68_v13, %v64_v8  ;;  %p213_p2 = scmp.ne.s32.totalorder %s143_s6, %s212_s8  ;;  %p217_p3 = scmp.lt.s32.totalorder %s143_s6, %s143_s6 }
  0x2b   :  { %84 = vadd.xlane.f32.xlu0 %v83_v14  ;;  %v86_v18 = vadd.f32 %v82_v11, %v81_v10  ;;  %v73_v24 = vadd.f32 %v70_v20, %v69_v19  ;;  %p218_p4 = scmp.lt.s32.totalorder %s216_s9, %s212_s8 }
  0x2c   :  { %94 = vadd.xlane.f32.xlu1 %v93_v17  ;;  %v96_v21 = vadd.f32 %v92_v16, %v91_v15  ;;  %v76_v25 = vadd.f32 %v72_v23, %v71_v22 }
  0x2d   :  { %p219_p5 = por %p218_p4, %p217_p3 }
  0x2e   :  { %v109_v38 = vld [vmem:[#allocation2] sm:$0xff] }
  0x2f   :  { %87 = vadd.xlane.f32.xlu0 %v86_v18  ;;  %v110_v44 = vld [vmem:[#allocation2 + $0x8] sm:$0xff]  ;;  %p220_p6 = pnand %p219_p5, %p213_p2 }
  0x30   :  { %97 = vadd.xlane.f32.xlu1 %v96_v21 }
  0x33   :  { %74 = vadd.xlane.f32.xlu0 %v73_v24 }
  0x34   :  { %77 = vadd.xlane.f32.xlu1 %v76_v25 }
  0xb8   :  { %v85_v27 = vpop.xlane.xlu0 %84 }
  0xb9   :  { %160 = vrsqrt.f32 %v85_v27  ;;  %v95_v28 = vpop.xlane.xlu1 %94 }
  0xba   :  { %162 = vrsqrt.f32 %v95_v28 }
  0xbc   :  { %v88_v29 = vpop.xlane.xlu0 %87 }
  0xbd   :  { %164 = vrsqrt.f32 %v88_v29  ;;  %v98_v30 = vpop.xlane.xlu1 %97 }
  0xbe   :  { %166 = vrsqrt.f32 %v98_v30 }
  0xc0   :  { %v75_v31 = vpop.xlane.xlu0 %74 }
  0xc1   :  { %v78_v35 = vpop.xlane.xlu1 %77 }
  0xc3   :  { %v161_v32 = vpop.eup %160 }
  0xc4   :  { %v163_v33 = vpop.eup %162  ;;  %v101_v34 = vmul.f32 %v161_v32, %v75_v31 }
  0xc6   :  { %v105_v36 = vmul.f32 %v163_v33, %v101_v34 }
  0xc7   :  { %v165_v37 = vpop.eup %164 }
  0xc8   :  { %v167_v39 = vpop.eup %166  ;;  %v107_v40 = vsub.f32 1.0, %v105_v36  ;;  %v102_v41 = vmul.f32 %v165_v37, %v78_v35 }
  0xca   :  { %v111_v42 = vadd.f32 %v109_v38, %v107_v40  ;;  %v106_v43 = vmul.f32 %v167_v39, %v102_v41 }
  0xcc   :  { %114 = vst.msk [vmem:[#allocation2] sm:$0xff] %vm58_vm0, %v111_v42  ;;  %v108_v45 = vsub.f32 1.0, %v106_v43 }
  0xce   :  { %v112_v46 = vadd.f32 %v110_v44, %v108_v45 }
  0xd0   :  { %115 = vst.msk [vmem:[#allocation2 + $0x8] sm:$0xff] %vm58_vm0, %v112_v46 }
  0xd3   :  { %v119_v47 = vld [vmem:[#allocation2] sm:$0xff] }
  0xd4   :  { %v121_v49 = vsel %vm58_vm0, %v119_v47, 0.0 }
  0xd7   :  { %v120_v48 = vld [vmem:[#allocation2 + $0x8] sm:$0xff] }
  0xd8   :  { %v122_v50 = vsel %vm58_vm0, %v120_v48, 0.0 }
  0xd9   :  { %v123_v51 = vadd.f32 %v122_v50, %v121_v49 }
  0xdb   :  { %124 = vadd.xlane.f32.xlu0 %v123_v51 }
 0x168   :  { %v125_v52 = vpop.xlane.xlu0 %124 }
 0x169   :  { %v126_v53 = vrot.slane %v125_v52, 4 }
 0x16b   :  { %v127_v54 = vadd.f32 %v126_v53, %v125_v52 }
 0x16d   :  { %v128_v55 = vrot.slane %v127_v54, 2 }
 0x16f   :  { %v129_v56 = vadd.f32 %v128_v55, %v127_v54 }
 0x171   :  { %v130_v57 = vrot.slane %v129_v56, 1 }
 0x173   :  { %v131_v58 = vadd.f32 %v130_v57, %v129_v56 }
 0x175   :  { %152 = vpush %v131_v58 }
 0x1a6   :  { %s153_s7 = spop %152 }
 0x1a7   :  { %v133_v59 = vstv %s153_s7 }
 0x1a8   :  { %135 = vst.msk [vmem:[#allocation8] sm:$0x1] %vm134_vm1, %v133_v59 }
 0x1a9   :  { %223 = shalt.err (!%p220_p6)
}
 0x1aa   :  { %s224_s12 = scalar_lea.hbm %s305_s2, 16 }
 0x1ab   :  { %p225_p7 = scmp.ne.s32.totalorder %s305_s2, %s224_s12  ;;  %p228_p8 = scmp.lt.u32.totalorder %s224_s12, %s305_s2 }
 0x1ad   :  { %p230_p9 = pnand %p228_p8, %p225_p7 }
 0x1af   :  { %233 = shalt.err (!%p230_p9)
}
 0x1b0   :  { %145 = dma.vmem_to_hbm [thread:$0]  %s143_s6, 16, %s305_s2, [#allocation5]  }
 0x1b1   :  { %238 = dma.done.wait [#allocation5], 16  }
 0x1b2   :  { %239 = vsyncadd [#allocation5], 4294967280 }
 0x1b3   :  { %149 = vsyncpa [#allocation4], 1 }
 0x1b4   :  { %150 = vsyncpa [#allocation7], 1 }
 0x1b5   :  { %151 = vsyncpa [#allocation5], 1 }

</bundles_post_ra>
